<compile_context>
chip_gen: v6e
topology: v6e:2x2x1
jax: 0.10.0
libtpu: 0.0.40
codegen_flags: <defaults>
</compile_context>

<pallas_src>
import functools
import math

import jax
import jax.numpy as jnp
from jax.experimental import pallas as pl
from jax.experimental.pallas import tpu as pltpu

_NEG_INF = -1e30  # plain Python float (finite "-inf" sentinel; never a jnp array)


def _qkv_proj_kernel(x_ref, w_ref, b_ref, o_ref):
    """One row-tile of the fused Q/K/V projection: o = x @ W_qkv + b_qkv."""
    acc = jnp.dot(x_ref[...], w_ref[...], preferred_element_type=jnp.float32)
    o_ref[...] = (acc + b_ref[...]).astype(o_ref.dtype)


def _flash_attn_kernel(q_ref, k_ref, v_ref, mask_ref, o_ref,
                       m_scr, l_scr, acc_scr, *, scale, block_q, block_k):
    """Causal flash attention for one (batch, head, q-tile, kv-tile) grid point."""
    qi = pl.program_id(2)
    ki = pl.program_id(3)
    q_start = qi * block_q
    k_start = ki * block_k

    @pl.when(ki == 0)
    def _init():
        m_scr[...] = jnp.full(m_scr.shape, _NEG_INF, jnp.float32)
        l_scr[...] = jnp.zeros(l_scr.shape, jnp.float32)
        acc_scr[...] = jnp.zeros(acc_scr.shape, jnp.float32)

    # Skip kv tiles that lie entirely above the diagonal (fully causally masked).
    @pl.when(k_start <= q_start + block_q - 1)
    def _compute():
        q = q_ref[0, 0] * scale                    # (tq, d); fold 1/sqrt(d) into q
        k = k_ref[0, 0]                            # (tk, d)
        v = v_ref[0, 0]                            # (tk, d)
        am = mask_ref[0, 0].astype(jnp.float32)    # (1, tk) key-wise additive mask

        # scores on the MXU (contract over head_dim), f32 accumulation
        s = jax.lax.dot_general(
            q, k, dimension_numbers=(((1,), (1,)), ((), ())),
            preferred_element_type=jnp.float32)    # (tq, tk)
        s = s + am

        # per-tile causal bias from grid offsets (no (T,T) table in VMEM)
        row = q_start + jax.lax.broadcasted_iota(jnp.int32, (block_q, block_k), 0)
        col = k_start + jax.lax.broadcasted_iota(jnp.int32, (block_q, block_k), 1)
        s = jnp.where(col > row, _NEG_INF, s)

        # online softmax update (all f32 VPU/EUP math)
        m_prev = m_scr[...]
        m_new = jnp.maximum(m_prev, jnp.max(s, axis=-1, keepdims=True))
        alpha = jnp.exp(m_prev - m_new)
        p = jnp.exp(s - m_new)
        l_scr[...] = alpha * l_scr[...] + jnp.sum(p, axis=-1, keepdims=True)
        acc_scr[...] = alpha * acc_scr[...] + jnp.dot(
            p.astype(v.dtype), v, preferred_element_type=jnp.float32)
        m_scr[...] = m_new

    @pl.when(ki == pl.num_programs(3) - 1)
    def _finalize():
        # approx=False: exact softmax normalization (see review correctness note).
        inv = pl.reciprocal(l_scr[...], approx=False)
        o_ref[0, 0] = (acc_scr[...] * inv).astype(o_ref.dtype)


def _pick_tile(total, preferred):
    """Largest tile <= preferred that divides `total` (falls back to full extent)."""
    t = min(preferred, total)
    while t > 8 and total % t:
        t //= 2
    return t if total % t == 0 else total


def causal_self_attention(hidden_states, attention_mask, params, *, num_heads,
                          mxu_dtype=jnp.float32, block_q=256, block_k=256,
                          block_m=256):
    """Matches the PyTorch CausalSelfAttention forward (eval mode, dropout = identity).

    hidden_states: [B, T, H]; attention_mask: [B, 1, 1, T] key-wise additive mask.
    Weights are [in, out] ("x @ W") orientation; biases are [out].
    mxu_dtype=jnp.bfloat16 enables the fast MXU path on v5e/v6e/v7x (all bf16-native
    MXUs); softmax / normalization math stays float32.  block_q/block_k=256 suit the
    v6e/v7x 256x256 MXU; use 128 on v5e.
    """
    B, T, H = hidden_states.shape
    d = H // num_heads
    M = B * T

    wq, bq, wk, bk, wv, bv = params
    # Wrapper-side casts: halve weight/activation HBM traffic on the bf16 path and
    # avoid holding both f32 and bf16 copies in VMEM.
    w_qkv = jnp.concatenate([wq, wk, wv], axis=1).astype(mxu_dtype)          # (H, 3H)
    b_qkv = jnp.concatenate([bq, bk, bv]).reshape(1, 3 * H).astype(jnp.float32)
    x2 = hidden_states.reshape(M, H).astype(mxu_dtype)

    # ---- Q/K/V projection: its own pallas_call (clean row-tiled GEMM) ----
    bm = _pick_tile(M, block_m)
    elt = jnp.dtype(mxu_dtype).itemsize
    qkv = pl.pallas_call(
        _qkv_proj_kernel,
        out_shape=jax.ShapeDtypeStruct((M, 3 * H), mxu_dtype),
        grid_spec=pltpu.PrefetchScalarGridSpec(
            num_scalar_prefetch=0,
            grid=(M // bm,),
            in_specs=[pl.BlockSpec((bm, H), lambda i: (i, 0)),
                      pl.BlockSpec((H, 3 * H), lambda i: (0, 0)),
                      pl.BlockSpec((1, 3 * H), lambda i: (0, 0))],
            out_specs=pl.BlockSpec((bm, 3 * H), lambda i: (i, 0))),
        compiler_params=pltpu.CompilerParams(dimension_semantics=("parallel",)),
        cost_estimate=pl.CostEstimate(
            flops=2 * M * H * 3 * H,
            transcendentals=0,
            bytes_accessed=M * H * elt + H * 3 * H * elt + M * 3 * H * elt),
    )(x2, w_qkv, b_qkv)

    # Lane-dense per-head layout (B, NH, T, d): layout plumbing stays in the wrapper.
    qkv = qkv.reshape(B, T, 3, num_heads, d)
    q = jnp.transpose(qkv[:, :, 0], (0, 2, 1, 3))
    k = jnp.transpose(qkv[:, :, 1], (0, 2, 1, 3))
    v = jnp.transpose(qkv[:, :, 2], (0, 2, 1, 3))

    # TODO(synk): attention_mask is assumed key-wise ([B,1,1,T]); query-varying masks
    #             are not supported by this layout.
    mask = attention_mask.astype(jnp.float32)                                # (B,1,1,T)

    tq = _pick_tile(T, block_q)
    tk = _pick_tile(T, block_k)
    grid = (B, num_heads, T // tq, T // tk)

    kernel = functools.partial(_flash_attn_kernel,
                               scale=float(1.0 / math.sqrt(d)),
                               block_q=tq, block_k=tk)

    out_elt = hidden_states.dtype.itemsize
    out = pl.pallas_call(
        kernel,
        out_shape=jax.ShapeDtypeStruct((B, num_heads, T, d), hidden_states.dtype),
        grid_spec=pltpu.PrefetchScalarGridSpec(
            num_scalar_prefetch=0,
            grid=grid,
            in_specs=[
                pl.BlockSpec((1, 1, tq, d), lambda b, h, i, j: (b, h, i, 0)),
                pl.BlockSpec((1, 1, tk, d), lambda b, h, i, j: (b, h, j, 0)),
                pl.BlockSpec((1, 1, tk, d), lambda b, h, i, j: (b, h, j, 0)),
                pl.BlockSpec((1, 1, 1, tk), lambda b, h, i, j: (b, 0, 0, j)),
            ],
            out_specs=pl.BlockSpec((1, 1, tq, d), lambda b, h, i, j: (b, h, i, 0)),
            scratch_shapes=[pltpu.VMEM((tq, 1), jnp.float32),   # running max
                            pltpu.VMEM((tq, 1), jnp.float32),   # running denom
                            pltpu.VMEM((tq, d), jnp.float32)]), # output accumulator
        compiler_params=pltpu.CompilerParams(
            dimension_semantics=("parallel", "parallel", "parallel", "arbitrary")),
        cost_estimate=pl.CostEstimate(
            flops=4 * B * num_heads * T * T * d,
            transcendentals=B * num_heads * T * T,
            bytes_accessed=3 * B * num_heads * T * d * elt
                           + B * T * 4
                           + B * num_heads * T * d * out_elt),
    )(q, k, v, mask)

    # (B, NH, T, d) -> (B, T, H)
    return jnp.transpose(out, (0, 2, 1, 3)).reshape(B, T, H)


if __name__ == "__main__":
    # config: hidden_size=32, num_attention_heads=4 -> head_dim=8
    B, T, H, NH = 2, 8, 32, 4

    key = jax.random.PRNGKey(0)
    ks = jax.random.split(key, 8)

    hidden_states = jax.random.normal(ks[0], (B, T, H), dtype=jnp.float32)
    # BERT-style additive key mask: 0 = attend; mask out last key of batch 1.
    attention_mask = jnp.zeros((B, 1, 1, T), dtype=jnp.float32)
    attention_mask = attention_mask.at[1, 0, 0, T - 1].set(-10000.0)

    scale = 1.0 / math.sqrt(H)
    wq = jax.random.uniform(ks[1], (H, H), jnp.float32, -scale, scale)
    bq = jax.random.uniform(ks[2], (H,), jnp.float32, -scale, scale)
    wk = jax.random.uniform(ks[3], (H, H), jnp.float32, -scale, scale)
    bk = jax.random.uniform(ks[4], (H,), jnp.float32, -scale, scale)
    wv = jax.random.uniform(ks[5], (H, H), jnp.float32, -scale, scale)
    bv = jax.random.uniform(ks[6], (H,), jnp.float32, -scale, scale)
    params = (wq, bq, wk, bk, wv, bv)

    # plain-JAX reference (mirrors the PyTorch module)
    def ref(x, am):
        q = (x @ wq + bq).reshape(B, T, NH, H // NH).transpose(0, 2, 1, 3)
        k = (x @ wk + bk).reshape(B, T, NH, H // NH).transpose(0, 2, 1, 3)
        v = (x @ wv + bv).reshape(B, T, NH, H // NH).transpose(0, 2, 1, 3)
        s = jnp.einsum('bhtd,bhsd->bhts', q, k) / math.sqrt(H // NH)
        causal = jnp.triu(jnp.ones((T, T), bool), k=1)
        s = jnp.where(causal[None, None], -jnp.inf, s) + am
        p = jax.nn.softmax(s, axis=-1)
        o = jnp.einsum('bhts,bhsd->bhtd', p, v)
        return o.transpose(0, 2, 1, 3).reshape(B, T, H)

    expected = ref(hidden_states, attention_mask)

    # 1) f32 MXU operands: module-exact semantics
    out_f32 = causal_self_attention(hidden_states, attention_mask, params,
                                    num_heads=NH, mxu_dtype=jnp.float32)
    out_f32 = jax.block_until_ready(out_f32)
    assert out_f32.shape == (B, T, H)
    assert jnp.allclose(out_f32, expected, atol=2e-3, rtol=2e-3), (
        f"f32 max err {jnp.max(jnp.abs(out_f32 - expected))}")

    # 2) bf16 MXU operands (fast path on v5e/v6e/v7x; softmax math stays f32)
    out_bf16 = causal_self_attention(hidden_states, attention_mask, params,
                                     num_heads=NH, mxu_dtype=jnp.bfloat16)
    out_bf16 = jax.block_until_ready(out_bf16)
    assert out_bf16.shape == (B, T, H)
    assert jnp.allclose(out_bf16, expected, atol=5e-2, rtol=5e-2), (
        f"bf16 max err {jnp.max(jnp.abs(out_bf16 - expected))}")

    print("KERNEL_OK")
</pallas_src>

<mosaic_0001>
module attributes {stable_mosaic.version = 11 : i64} {
  func.func @_qkv_proj_kernel(%arg0: i32, %arg1: memref<16x32xf32, #tpu.memory_space<vmem>>, %arg2: memref<32x96xf32, #tpu.memory_space<vmem>>, %arg3: memref<1x96xf32, #tpu.memory_space<vmem>>, %arg4: memref<16x96xf32, #tpu.memory_space<vmem>>) attributes {dimension_semantics = [#tpu.dimension_semantics<parallel>], iteration_bounds = array<i64: 1>, scalar_prefetch = 0 : i64, scratch_operands = 0 : i64, tpu.core_type = #tpu.core_type<tc>, window_params = [{transform_indices = @transform_0, window_bounds = array<i64: 16, 32>}, {pipeline_mode = #tpu.pipeline_mode<synchronous>, transform_indices = @transform_1, window_bounds = array<i64: 32, 96>}, {pipeline_mode = #tpu.pipeline_mode<synchronous>, transform_indices = @transform_2, window_bounds = array<i64: 1, 96>}, {transform_indices = @transform_3, window_bounds = array<i64: 16, 96>}]} {
    %c0 = arith.constant 0 : index
    %c0_0 = arith.constant 0 : index
    %0 = vector.load %arg1[%c0, %c0_0] : memref<16x32xf32, #tpu.memory_space<vmem>>, vector<16x32xf32>
    %c0_1 = arith.constant 0 : index
    %c0_2 = arith.constant 0 : index
    %1 = vector.load %arg2[%c0_1, %c0_2] : memref<32x96xf32, #tpu.memory_space<vmem>>, vector<32x96xf32>
    %cst = arith.constant dense<0.000000e+00> : vector<16x96xf32>
    %2 = tpu.matmul %0, %1, %cst {dimension_numbers = #tpu.dot_dimension_numbers<[1], [0], [0], [1], [0, 0, 1, 1], [], []>} : vector<16x32xf32>, vector<32x96xf32>, vector<16x96xf32> -> vector<16x96xf32>
    %c0_3 = arith.constant 0 : index
    %c0_4 = arith.constant 0 : index
    %3 = vector.load %arg3[%c0_3, %c0_4] : memref<1x96xf32, #tpu.memory_space<vmem>>, vector<1x96xf32>
    %4 = vector.broadcast %3 : vector<1x96xf32> to vector<16x96xf32>
    %5 = arith.addf %2, %4 : vector<16x96xf32>
    %c0_5 = arith.constant 0 : index
    %c0_6 = arith.constant 0 : index
    %6 = vector.load %arg4[%c0_5, %c0_6] : memref<16x96xf32, #tpu.memory_space<vmem>>, vector<16x96xf32>
    tpu.vector_store %arg4[%c0_5, %c0_6], %5 {strides = array<i32>} : memref<16x96xf32, #tpu.memory_space<vmem>>, vector<16x96xf32>,
    return
  }
  func.func @transform_0(%arg0: i32) -> (i32, i32) {
    %c0_i32 = arith.constant 0 : i32
    %c0_i32_0 = arith.constant 0 : i32
    return %arg0, %c0_i32 : i32, i32
  }
  func.func @transform_1(%arg0: i32) -> (i32, i32) {
    %c0_i32 = arith.constant 0 : i32
    %c0_i32_0 = arith.constant 0 : i32
    %c0_i32_1 = arith.constant 0 : i32
    return %c0_i32, %c0_i32_0 : i32, i32
  }
  func.func @transform_2(%arg0: i32) -> (i32, i32) {
    %c0_i32 = arith.constant 0 : i32
    %c0_i32_0 = arith.constant 0 : i32
    %c0_i32_1 = arith.constant 0 : i32
    return %c0_i32, %c0_i32_0 : i32, i32
  }
  func.func @transform_3(%arg0: i32) -> (i32, i32) {
    %c0_i32 = arith.constant 0 : i32
    %c0_i32_0 = arith.constant 0 : i32
    return %arg0, %c0_i32 : i32, i32
  }
}

</mosaic_0001>

<bundles_post_ra>
// kernel: tpu_custom_call.1
= control target key start
LH: loop header
LB: loop body
LE: loop exit
PB: predicated region body
PF: predicated region fallthrough
CT: control target
= control target key end

     0   :  { %8 = vsyncpa [#allocation3], 0  ;;  %s298_s0 = inlined_call_operand.hbm [shape: f32[16,32], index: 0, kind: input, shape index: {}]   ;;  %s299_s1 = inlined_call_operand.hbm [shape: f32[32,96], index: 1, kind: input, shape index: {}]   ;;  %s300_s2 = inlined_call_operand.vmem [shape: f32[1,96], index: 2, kind: input, shape index: {}]   ;;  %s301_s3 = inlined_call_operand.hbm [shape: f32[16,96], index: 3, kind: output, shape index: {}]  }
   0x1   :  { %9 = vsyncpa [#allocation6], 0 }
   0x2   :  { %10 = vsyncpa [#allocation4], 0  ;;  %s250_s12 = smov [#allocation2]  }
   0x3   :  { %s16_s13 = sshll.u32 %s250_s12, 4  ;;  %s17_s13 = int_to_ptr.vmem [resolvable:$true] %s16_s13 }
   0x4   :  { %s192_s14 = scalar_lea.vmem %s17_s13, 256  ;;  %p197_p1 = scmp.lt.s32.totalorder %s17_s13, %s17_s13 }
   0x5   :  { %p193_p0 = scmp.ne.s32.totalorder %s17_s13, %s192_s14  ;;  %p198_p2 = scmp.lt.s32.totalorder %s192_s14, %s192_s14 }
   0x7   :  { %p199_p3 = por %p198_p2, %p197_p1 }
   0x9   :  { %p200_p4 = pnand %p199_p3, %p193_p0 }
   0xb   :  { %203 = shalt.err (!%p200_p4)
}
   0xc   :  { %s251_s15 = smov 128   ;;  %s252_s16 = smov 8  }
   0xd   :  { %22 = dma.hbm_to_vmem [thread:$0]  %s298_s0, 256, %s17_s13, [#allocation3], %s251_s15, %s251_s15, %s252_s16  }
   0xe   :  { %s253_s19 = smov [#allocation5]  }
   0xf   :  { %s28_s20 = sshll.u32 %s253_s19, 4  ;;  %s29_s20 = int_to_ptr.vmem [resolvable:$true] %s28_s20 }
  0x10   :  { %s212_s21 = scalar_lea.vmem %s29_s20, 512  ;;  %p217_p6 = scmp.lt.s32.totalorder %s29_s20, %s29_s20 }
  0x11   :  { %p213_p5 = scmp.ne.s32.totalorder %s29_s20, %s212_s21  ;;  %p218_p7 = scmp.lt.s32.totalorder %s212_s21, %s212_s21 }
  0x13   :  { %p219_p8 = por %p218_p7, %p217_p6 }
  0x15   :  { %p220_p9 = pnand %p219_p8, %p213_p5 }
  0x17   :  { %223 = shalt.err (!%p220_p9)
}
  0x18   :  { %34 = dma.hbm_to_vmem [thread:$0]  %s299_s1, 512, %s29_s20, [#allocation6], %s251_s15, %s251_s15, %s252_s16  }
  0x19   :  { %244 = dma.done.wait [#allocation3], 256  }
  0x1a   :  { %245 = vsyncadd [#allocation3], 4294967040 }
  0x1b   :  { %246 = dma.done.wait [#allocation6], 512  }
  0x1c   :  { %247 = vsyncadd [#allocation6], 4294966784  ;;  %vm56_vm0 = vcmask 261120   ;;  %v48_v0 = vld [vmem:[#allocation5 + $0x18] sm:$0xff]  ;;  %v47_v1 = vld [vmem:[#allocation5 + $0x10] sm:$0xff]  ;;  %vm138_vm1 = vcmask 785408  }
  0x1d   :  { %168 = vmatprep.subr.mxu0 %v48_v0  ;;  %v43_v2 = vld [vmem:[#allocation2] sm:$0xff]  ;;  %v46_v3 = vld [vmem:[#allocation5 + $0x8] sm:$0xff]  ;;  %v45_v4 = vld [vmem:[#allocation5] sm:$0xff]  ;;  %s254_s24 = smov [#allocation7]  }
  0x1e   :  { %169 = vmatpush3.msra.mxu0 %v48_v0  ;;  %176 = vmatprep.mubr.msk.f32.mxu0 %vm56_vm0, %v43_v2  ;;  %v44_v5 = vld [vmem:[#allocation2 + $0x8] sm:$0xff]  ;;  %v159_v6 = vld [vmem:[%s300_s2] ss:$0 sm:$0xff]  ;;  %s146_s25 = sshll.u32 %s254_s24, 4  ;;  %s147_s25 = int_to_ptr.vmem [resolvable:$true] %s146_s25 }
  0x1f   :  { %170 = vmatprep.subr.mxu0 %v47_v1  ;;  %s224_s26 = scalar_lea.vmem %s147_s25, 256  ;;  %p229_p11 = scmp.lt.s32.totalorder %s147_s25, %s147_s25 }
  0x20   :  { %171 = vmatpush3.msra.mxu0 %v47_v1  ;;  %p225_p10 = scmp.ne.s32.totalorder %s147_s25, %s224_s26  ;;  %p230_p12 = scmp.lt.s32.totalorder %s224_s26, %s224_s26 }
  0x21   :  { %172 = vmatprep.subr.mxu0 %v46_v3 }
  0x22   :  { %173 = vmatpush3.msra.mxu0 %v46_v3  ;;  %p231_p13 = por %p230_p12, %p229_p11 }
  0x23   :  { %174 = vmatprep.subr.mxu0 %v45_v4 }
  0x24   :  { %175 = vmatpush3.msra.mxu0 %v45_v4  ;;  %p232_p0 = pnand %p231_p13, %p225_p10 }
  0x25   :  { %177 = vmatmul.mubr.msk.f32.vlgmr.msra.gmra.mxu0 %vm56_vm0, %v44_v5 }
  0xe5   :  { %v178_v7 = vpop.f32.mrf.mxu0 }
  0xe6   :  { %v135_v8 = vadd.f32 %v178_v7, %v159_v6 }
  0xe7   :  { %v129_v9 = vpop.f32.mrf.mxu0 }
  0xe8   :  { %v130_v10 = vadd.f32 %v159_v6, %v129_v9  ;;  %140 = vst.msk [vmem:[#allocation7 + $0x8] sm:$0xff] %vm138_vm1, %v135_v8 }
  0xea   :  { %139 = vst.msk [vmem:[#allocation7] sm:$0xff] %vm138_vm1, %v130_v10 }
  0xeb   :  { %235 = shalt.err (!%p232_p0)
}
  0xec   :  { %152 = dma.vmem_to_hbm [thread:$0]  %s147_s25, 256, %s301_s3, [#allocation4], %s251_s15, %s251_s15, %s252_s16  }
  0xed   :  { %248 = dma.done.wait [#allocation4], 256  }
  0xee   :  { %249 = vsyncadd [#allocation4], 4294967040 }
  0xef   :  { %156 = vsyncpa [#allocation3], 1 }
  0xf0   :  { %157 = vsyncpa [#allocation6], 1 }
  0xf1   :  { %158 = vsyncpa [#allocation4], 1 }

</bundles_post_ra>
